<compile_context>
chip_gen: v6e
topology: v6e:2x2x1
jax: 0.10.0
libtpu: 0.0.40
codegen_flags: <defaults>
</compile_context>

<pallas_src>
import jax
import jax.numpy as jnp
from jax.experimental import pallas as pl
from jax.experimental.pallas import tpu as pltpu


def hard_attention_kernel(y_ref, att_ref, out_ref):
    # y_ref  : (Bt, Ly, D)   VMEM
    # att_ref: (Bt, Lq, Ly)  VMEM
    # out_ref: (Bt, Lq, D)   VMEM output (lane-dense: D on lanes)
    att = att_ref[...]
    y = y_ref[...]
    Ly = att.shape[-1]

    # argmax over the last axis, first occurrence on ties (== torch.argmax /
    # jnp.argmax semantics), built from primitives that lower cleanly:
    #   idx = min over { l : att[..., l] == max_l att[..., l] }
    m = jnp.max(att, axis=-1, keepdims=True)                     # (Bt, Lq, 1)
    lane = jax.lax.broadcasted_iota(jnp.int32, att.shape, 2)     # (Bt, Lq, Ly)
    idx = jnp.min(jnp.where(att == m, lane, jnp.int32(Ly)),
                  axis=-1, keepdims=True)                        # (Bt, Lq, 1)

    # Hard-attention gather as a one-hot matmul on the MXU:
    #   out[b, q, :] = sum_l onehot[b, q, l] * y[b, l, :]
    # one-hot is exactly 0/1, so the result equals the gathered row exactly.
    onehot = (lane == idx).astype(y.dtype)                       # (Bt, Lq, Ly)
    out = jnp.einsum("bql,bld->bqd", onehot, y,
                     preferred_element_type=jnp.float32)
    out_ref[...] = out.astype(out_ref.dtype)


def apply_hard_attention(y, att, *, batch_tile=1):
    """y: (B, Ly, D), att: (B, Lq, Ly) -> gathered y of shape (B, Lq, D)."""
    B, Ly, D = y.shape
    Bq, Lq, La = att.shape
    assert Bq == B and La == Ly, "batch / key-length mismatch between y and att"
    bt = max(1, min(batch_tile, B))
    grid = (pl.cdiv(B, bt),)

    itemsize_y = jnp.dtype(y.dtype).itemsize
    itemsize_a = jnp.dtype(att.dtype).itemsize
    cost = pl.CostEstimate(
        flops=2 * B * Lq * Ly * D,  # one-hot matmul dominates
        transcendentals=0,
        bytes_accessed=(B * Ly * D * itemsize_y
                        + B * Lq * Ly * itemsize_a
                        + B * Lq * D * itemsize_y),
    )

    return pl.pallas_call(
        hard_attention_kernel,
        out_shape=jax.ShapeDtypeStruct((B, Lq, D), y.dtype),
        grid_spec=pltpu.PrefetchScalarGridSpec(
            num_scalar_prefetch=0,
            grid=grid,
            in_specs=[
                pl.BlockSpec((bt, Ly, D), lambda b: (b, 0, 0)),
                pl.BlockSpec((bt, Lq, Ly), lambda b: (b, 0, 0)),
            ],
            out_specs=pl.BlockSpec((bt, Lq, D), lambda b: (b, 0, 0)),
        ),
        compiler_params=pltpu.CompilerParams(
            dimension_semantics=("parallel",),
        ),
        cost_estimate=cost,
    )(y, att)


if __name__ == "__main__":
    # Small shapes consistent with the module: B=2, Ly=16 keys, Lq=8 queries, D=32 feats
    B, Lq, Ly, D = 2, 8, 16, 32
    key = jax.random.PRNGKey(0)
    ky, ka = jax.random.split(key, 2)

    y = jax.random.normal(ky, (B, Ly, D), dtype=jnp.float32)
    att = jax.random.normal(ka, (B, Lq, Ly), dtype=jnp.float32)

    # batch_tile=1 -> grid=(B,)=2 parallel steps (keeps both v7x TCs busy);
    # raise batch_tile at larger B to amortize per-step pipeline overhead.
    out = apply_hard_attention(y, att, batch_tile=1)
    out = jax.block_until_ready(out)

    # Pure-JAX reference: idx = argmax over keys, then advanced-index gather.
    idx_ref = jnp.argmax(att, axis=2)                       # (B, Lq)
    out_ref = y[jnp.arange(B)[:, None], idx_ref]            # (B, Lq, D)

    assert out.shape == (B, Lq, D)
    assert jnp.allclose(out, out_ref, atol=1e-6, rtol=1e-6)

    print("KERNEL_OK")
</pallas_src>

<mosaic_0001>
module attributes {stable_mosaic.version = 11 : i64} {
  func.func @hard_attention_kernel(%arg0: i32, %arg1: memref<1x16x32xf32, #tpu.memory_space<vmem>>, %arg2: memref<1x8x16xf32, #tpu.memory_space<vmem>>, %arg3: memref<1x8x32xf32, #tpu.memory_space<vmem>>) attributes {dimension_semantics = [#tpu.dimension_semantics<parallel>], iteration_bounds = array<i64: 2>, scalar_prefetch = 0 : i64, scratch_operands = 0 : i64, tpu.core_type = #tpu.core_type<tc>, window_params = [{transform_indices = @transform_0, window_bounds = array<i64: 1, 16, 32>}, {transform_indices = @transform_1, window_bounds = array<i64: 1, 8, 16>}, {transform_indices = @transform_2, window_bounds = array<i64: 1, 8, 32>}]} {
    %c0 = arith.constant 0 : index
    %c0_0 = arith.constant 0 : index
    %c0_1 = arith.constant 0 : index
    %0 = vector.load %arg2[%c0, %c0_0, %c0_1] : memref<1x8x16xf32, #tpu.memory_space<vmem>>, vector<1x8x16xf32>
    %c0_2 = arith.constant 0 : index
    %c0_3 = arith.constant 0 : index
    %c0_4 = arith.constant 0 : index
    %1 = vector.load %arg1[%c0_2, %c0_3, %c0_4] : memref<1x16x32xf32, #tpu.memory_space<vmem>>, vector<1x16x32xf32>
    %cst = arith.constant dense<0xFF800000> : vector<1x8xf32>
    %2 = vector.multi_reduction <maximumf>, %0, %cst [2] : vector<1x8x16xf32> to vector<1x8xf32>
    %3 = vector.shape_cast %2 : vector<1x8xf32> to vector<1x8x1xf32>
    %4 = tpu.iota {dimensions = array<i32: 2>} : vector<1x8x16xi32>
    %5 = vector.broadcast %3 : vector<1x8x1xf32> to vector<1x8x16xf32>
    %6 = arith.cmpf oeq, %0, %5 : vector<1x8x16xf32>
    %c16_i32 = arith.constant 16 : i32
    %7 = vector.broadcast %c16_i32 : i32 to vector<1x8x16xi32>
    %8 = arith.select %6, %4, %7 : vector<1x8x16xi1>, vector<1x8x16xi32>
    %cst_5 = arith.constant dense<2147483647> : vector<1x8xi32>
    %9 = vector.multi_reduction <minsi>, %8, %cst_5 [2] : vector<1x8x16xi32> to vector<1x8xi32>
    %10 = vector.shape_cast %9 : vector<1x8xi32> to vector<1x8x1xi32>
    %11 = vector.broadcast %10 : vector<1x8x1xi32> to vector<1x8x16xi32>
    %12 = arith.cmpi eq, %4, %11 : vector<1x8x16xi32>
    %13 = arith.extui %12 : vector<1x8x16xi1> to vector<1x8x16xi32>
    %14 = arith.sitofp %13 : vector<1x8x16xi32> to vector<1x8x16xf32>
    "tpu.trace_start"() <{level = 10 : i32, message = "bql,bld->bqd"}> : () -> ()
    %cst_6 = arith.constant dense<0.000000e+00> : vector<1x8x32xf32>
    %15 = tpu.matmul %14, %1, %cst_6 {dimension_numbers = #tpu.dot_dimension_numbers<[2], [1], [1], [2], [0, 0, 0, 1, 1, 2], [0], [0]>} : vector<1x8x16xf32>, vector<1x16x32xf32>, vector<1x8x32xf32> -> vector<1x8x32xf32>
    "tpu.trace_stop"() : () -> ()
    %c0_7 = arith.constant 0 : index
    %c0_8 = arith.constant 0 : index
    %c0_9 = arith.constant 0 : index
    %16 = vector.load %arg3[%c0_7, %c0_8, %c0_9] : memref<1x8x32xf32, #tpu.memory_space<vmem>>, vector<1x8x32xf32>
    tpu.vector_store %arg3[%c0_7, %c0_8, %c0_9], %15 {strides = array<i32>} : memref<1x8x32xf32, #tpu.memory_space<vmem>>, vector<1x8x32xf32>,
    return
  }
  func.func @transform_0(%arg0: i32) -> (i32, i32, i32) {
    %c0_i32 = arith.constant 0 : i32
    %c0_i32_0 = arith.constant 0 : i32
    %c0_i32_1 = arith.constant 0 : i32
    return %arg0, %c0_i32, %c0_i32_0 : i32, i32, i32
  }
  func.func @transform_1(%arg0: i32) -> (i32, i32, i32) {
    %c0_i32 = arith.constant 0 : i32
    %c0_i32_0 = arith.constant 0 : i32
    %c0_i32_1 = arith.constant 0 : i32
    return %arg0, %c0_i32, %c0_i32_0 : i32, i32, i32
  }
  func.func @transform_2(%arg0: i32) -> (i32, i32, i32) {
    %c0_i32 = arith.constant 0 : i32
    %c0_i32_0 = arith.constant 0 : i32
    %c0_i32_1 = arith.constant 0 : i32
    return %arg0, %c0_i32, %c0_i32_0 : i32, i32, i32
  }
}

</mosaic_0001>

<bundles_post_ra>
// kernel: tpu_custom_call.1
= control target key start
LH: loop header
LB: loop body
LE: loop exit
PB: predicated region body
PF: predicated region fallthrough
CT: control target
= control target key end

     0   :  { %7 = vsyncpa [#allocation3], 0  ;;  %s846_s0 = inlined_call_operand.hbm [shape: f32[2,16,32], index: 0, kind: input, shape index: {}]   ;;  %s847_s1 = inlined_call_operand.hbm [shape: f32[2,8,16], index: 1, kind: input, shape index: {}]   ;;  %s848_s2 = inlined_call_operand.hbm [shape: f32[2,8,32], index: 2, kind: output, shape index: {}]  }
   0x1   :  { %9 = vsyncpa [#allocation3 + $0x1], 0 }
   0x2   :  { %10 = vsyncpa [#allocation6], 0 }
   0x3   :  { %12 = vsyncpa [#allocation6 + $0x1], 0 }
   0x4   :  { %13 = vsyncpa [#allocation4], 0 }
   0x5   :  { %15 = vsyncpa [#allocation4 + $0x1], 0  ;;  %s642_s9 = smov 0   ;;  %s644_s10 = smov 0  }
   0x6   :  { %s646_s11 = smov 0   ;;  %s648_s12 = smov 0  }
   0x7 LB: > { %s663_s13 = sadd.s32 4294967295, %s618_s12   ;;  %s410_s14 = sadd.s32 4294967294, %s618_s12   ;;  %s618_s12 = sphi %s648_s12, %s865_s12   ;;  %s614_s11 = sphi %s646_s11, %s864_s11   ;;  %s610_s10 = sphi %s644_s10, %s863_s10   ;;  %s606_s9 = sphi %s642_s9, %s862_s9  }
   0x8   : > { %s667_s15 = sadd.s32 1, %s618_s12   ;;  %s28_s16 = sadd.s32 1, %s614_s11 }
   0x9   : > { %s25_s17 = ssub.s32 %s618_s12, %s667_s15  ;;  %p35_p0 = scmp.ne.s32.totalorder %s614_s11, %s610_s10 }
   0xa   : > { %p26_p1 = scmp.eq.s32.totalorder %s25_s17, 0  ;;  %p36_p2 = scmp.eq.s32.totalorder %s618_s12, 0 }
   0xb   : > { %p41_p3 = scmp.ne.s32.totalorder %s610_s10, %s606_s9  ;;  %p42_p4 = scmp.eq.s32.totalorder %s663_s13, 0 }
   0xc   : > { %s679_s18 = scalar_select %p26_p1, %s614_s11, %s28_s16  }
   0xd   : > { %p681_p5 = por %p36_p2, %p35_p0  ;;  %p685_p6 = por %p42_p4, %p41_p3 }
   0xe   : > { %p91_p7 = scmp.eq.s32.totalorder %s663_s13, 1  ;;  %p97_p8 = scmp.eq.s32.totalorder %s410_s14, 1 }
   0xf   : > { %s852_s20 = scalar_select %p685_p6, 1, 0 }
  0x10   : > { %p456_p10 = scmp.lt.s32.totalorder %s618_s12, 2  ;;  %p692_p11 = por %p91_p7, %p35_p0 }
  0x11   : > { %p696_p12 = por %p97_p8, %p41_p3  ;;  %s701_s23 = sand.u32 1, %s614_s11  }
  0x12   : > { %s853_s21 = scalar_select %p692_p11, 1, 0 }
  0x13   : > { %s854_s22 = scalar_select %p696_p12, 1, 0 }
  0x14   : > { %s428_s24 = sshll.u32 %s618_s12, 8  ;;  %s413_s25 = sshll.u32 %s701_s23, 4 }
  0x15   : > { %s708_s28 = scalar_lea.hbm %s846_s0, %s428_s24  ;;  %s121_s29 = scalar_lea.vmem [#allocation2], %s413_s25 }
  0x16   : > { %s128_s30 = sshll.u32 %s121_s29, 4  ;;  %p712_p13 = pnand %p456_p10, %p681_p5  ;;  %s716_s30 = int_to_ptr.vmem [resolvable:$true] %s128_s30 }
  0x17   : > { %s118_s4 = scalar_lea.sflag [#allocation3], %s701_s23  ;;  %s494_s5 = scalar_lea.hbm %s708_s28, 256 }
  0x18   : > { %p495_p0 = scmp.ne.s32.totalorder %s708_s28, %s494_s5  ;;  %p496_p1 = pneg %p712_p13 }
  0x19   : > { %s499_s8 = scalar_lea.hbm %s846_s0, 512  ;;  %p500_p4 = scmp.lt.s32.totalorder %s708_s28, %s846_s0 }
  0x1a   : > { %p497_p2 = pnand %p496_p1, %p495_p0  ;;  %p501_p5 = scmp.lt.s32.totalorder %s499_s8, %s494_s5 }
  0x1c   : > { %p498_p3 = pneg %p497_p2  ;;  %p502_p7 = por %p501_p5, %p500_p4 }
  0x1e   : > { %p503_p8 = pnand %p502_p7, %p498_p3 }
  0x20   : > { %506 = shalt.err (!%p503_p8)
}
  0x21   : > { %s507_s17 = scalar_lea.vmem %s716_s30, 256  ;;  %s620_s19 = smov [#allocation2]  }
  0x22   : > { %p508_p10 = scmp.ne.s32.totalorder %s716_s30, %s507_s17  ;;  %s512_s24 = sshll.u32 %s620_s19, 4  ;;  %s513_s24 = int_to_ptr.vmem [resolvable:$false] %s512_s24 }
  0x23   : > { %s514_s25 = scalar_lea.vmem %s513_s24, 512  ;;  %p515_p9 = scmp.lt.s32.totalorder %s716_s30, %s513_s24 }
  0x24   : > { %p510_p0 = pnand %p508_p10, %p496_p1  ;;  %p516_p12 = scmp.lt.s32.totalorder %s514_s25, %s507_s17 }
  0x26   : > { %p511_p2 = pneg %p510_p0  ;;  %p517_p11 = por %p516_p12, %p515_p9 }
  0x28   : > { %p518_p4 = pnand %p517_p11, %p511_p2 }
  0x2a   : > { %521 = shalt.err (!%p518_p4)
}
  0x2b   : > { %s621_s26 = smov 128   ;;  %s622_s27 = smov 8  }
  0x2c   : > { %448 = dma.hbm_to_vmem [thread:$0]  (!%p712_p13), %s708_s28, 256, %s716_s30, %s118_s4, %s621_s26, %s621_s26, %s622_s27  }
  0x2d   : > { %p418_p3 = scmp.ge.s32.totalorder %s618_s12, 1  ;;  %p154_p5 = scmp.lt.s32.totalorder %s618_s12, 3 }
  0x2e   : > { %s416_s29 = sshll.u32 %s701_s23, 3  ;;  %s417_s6 = sshll.u32 %s618_s12, 7 }
  0x2f   : > { %p748_p9 = pnand %p418_p3, %p154_p5  ;;  %s142_s7 = scalar_lea.vmem [#allocation5], %s416_s29 }
  0x30   : > { %s149_s8 = sshll.u32 %s142_s7, 4  ;;  %s147_s17 = scalar_lea.hbm %s847_s1, %s417_s6  ;;  %s150_s8 = int_to_ptr.vmem [resolvable:$true] %s149_s8 }
  0x31   : > { %s856_s5 = scalar_select %p748_p9, 1, 0 }
  0x32   : > { %s139_s19 = scalar_lea.sflag [#allocation6], %s701_s23  ;;  %s522_s24 = scalar_lea.hbm %s147_s17, 128 }
  0x33   : > { %p523_p11 = scmp.ne.s32.totalorder %s147_s17, %s522_s24  ;;  %s527_s4 = scalar_lea.hbm %s847_s1, 256 }
  0x34   : > { %p528_p8 = scmp.lt.s32.totalorder %s147_s17, %s847_s1  ;;  %p529_p10 = scmp.lt.s32.totalorder %s527_s4, %s522_s24 }
  0x35   : > { %p525_p12 = pnand %p523_p11, %p496_p1 }
  0x36   : > { %p530_p0 = por %p529_p10, %p528_p8 }
  0x37   : > { %p526_p7 = pneg %p525_p12 }
  0x39   : > { %p531_p2 = pnand %p530_p0, %p526_p7 }
  0x3b   : > { %534 = shalt.err (!%p531_p2)
}
  0x3c   : > { %s535_s27 = scalar_lea.vmem %s150_s8, 128  ;;  %s623_s23 = smov [#allocation5]  }
  0x3d   : > { %p536_p4 = scmp.ne.s32.totalorder %s150_s8, %s535_s27  ;;  %s540_s29 = sshll.u32 %s623_s23, 4  ;;  %s541_s29 = int_to_ptr.vmem [resolvable:$false] %s540_s29 }
  0x3e   : > { %s542_s6 = scalar_lea.vmem %s541_s29, 256  ;;  %p543_p11 = scmp.lt.s32.totalorder %s150_s8, %s541_s29 }
  0x3f   : > { %p538_p3 = pnand %p536_p4, %p496_p1  ;;  %p544_p12 = scmp.lt.s32.totalorder %s542_s6, %s535_s27 }
  0x41   : > { %p539_p5 = pneg %p538_p3  ;;  %p545_p6 = por %p544_p12, %p543_p11 }
  0x43   : > { %p546_p9 = pnand %p545_p6, %p539_p5 }
  0x45   : > { %549 = shalt.err (!%p546_p9)
}
  0x46   : > { %451 = dma.hbm_to_vmem [thread:$0]  (!%p712_p13), %s147_s17, 128, %s150_s8, %s139_s19  }
  0x47   : > { %p857_p7 = scmp.ne.s32.totalorder %s856_s5, 0 }
  0x48   : > { %s774_s7 = sand.u32 (!%p857_p7), 1, %s610_s10   ;;  %p858_p1 = scmp.ne.s32.totalorder (!%p857_p7), %s852_s20, 0 }
  0x49   : > { %158 = sbr.rel (%p857_p7) target bundleno = 720 (0x2d0), region = 28  ;;  %s419_s14 = sshll.u32 (!%p857_p7), %s774_s7, 4 }
  0x4a   : > { %s161_s16 = scalar_lea.sflag (!%p857_p7), [#allocation3], %s774_s7  ;;  %s778_s24 = scalar_lea.vmem (!%p857_p7), [#allocation2], %s419_s14 }
  0x4e   : > { %593 = dma.done.wait (%p858_p1), %s161_s16, 256  }
  0x4f   : > { %595 = vsyncadd (%p858_p1), %s161_s16, 4294967040  ;;  %s420_s3 = sshll.u32 %s774_s7, 3  ;;  %s170_s5 = scalar_lea.sflag [#allocation6], %s774_s7 }
  0x50   : > { %s173_s8 = scalar_lea.vmem [#allocation5], %s420_s3 }
  0x51   : > { %597 = dma.done.wait (%p858_p1), %s170_s5, 128  }
  0x52   : > { %599 = vsyncadd (%p858_p1), %s170_s5, 4294967168  ;;  %vm202_vm0 = vcmask 130048   ;;  %v199_v0 = vld [vmem:[%s173_s8] sm:$0xff]  ;;  %v206_v2 = vlaneseq  ;;  %v624_v13 = vmov 0.0   ;;  %v201_v14 = vld [vmem:[%s778_s24 + $0x8] sm:$0xff]  ;;  %vm625_vm3 = vmmov 0  }
  0x53   : > { %v203_v1 = vsel %vm202_vm0, %v199_v0, -inf  ;;  %432 = vmatprep.subr.mxu0 %v624_v13  ;;  %v200_v15 = vld [vmem:[%s778_s24] sm:$0xff]  ;;  %436 = vmatprep.mubr.msk.f32.mxu0 %vm625_vm3, %v624_v13  ;;  %s425_s20 = sshll.u32 %s663_s13, 7  ;;  %s198_s17 = scalar_lea.vmem [#allocation7], %s420_s3  ;;  %vm301_vm5 = vcmask 261120  }
  0x54   : > { %204 = vmax.xlane.f32.xlu0 %v203_v1  ;;  %v207_v3 = vand.u32 127, %v206_v2  ;;  %433 = vmatpush3.msra.mxu0 %v201_v14  ;;  %s317_s19 = sshll.u32 %s198_s17, 4  ;;  %s803_s4 = scalar_lea.hbm %s848_s2, %s425_s20  ;;  %s805_s19 = int_to_ptr.vmem [resolvable:$true] %s317_s19 }
  0x55   : > { %434 = vmatprep.subr.mxu0 %v624_v13  ;;  %s304_s25 = scalar_lea.sflag [#allocation4], %s774_s7  ;;  %s550_s26 = scalar_lea.vmem %s805_s19, 128 }
  0x56   : > { %435 = vmatpush3.msra.mxu0 %v200_v15  ;;  %p551_p6 = scmp.ne.s32.totalorder %s805_s19, %s550_s26  ;;  %p859_p13 = scmp.ne.s32.totalorder %s853_s21, 0 }
  0x57   : > { %s626_s13 = smov [#allocation7]  }
  0x58   : > { %p552_p9 = pnand %p551_p6, %p859_p13  ;;  %s554_s27 = sshll.u32 %s626_s13, 4  ;;  %s555_s27 = int_to_ptr.vmem [resolvable:$false] %s554_s27 }
  0x59   : > { %s556_s23 = scalar_lea.vmem %s555_s27, 256  ;;  %p557_p10 = scmp.lt.s32.totalorder %s805_s19, %s555_s27 }
  0x5a   : > { %p553_p8 = pneg %p552_p9  ;;  %p558_p0 = scmp.lt.s32.totalorder %s556_s23, %s550_s26 }
  0x5c   : > { %p559_p2 = por %p558_p0, %p557_p10 }
  0x5e   : > { %p560_p4 = pnand %p559_p2, %p553_p8 }
  0xdd   : > { %v205_v4 = vpop.xlane.xlu0 %204 }
  0xde   : > { %vm208_vm1 = vcmp.eq.f32.partialorder %v199_v0, %v205_v4 }
  0xdf   : > { %v209_v5 = vsel %vm208_vm1, %v207_v3, 16 }
  0xe0   : > { %v210_v6 = vsel %vm202_vm0, %v209_v5, 2147483647 }
  0xe1   : > { %v212_v7 = vshra.s32 %v210_v6, 16  ;;  %v211_v9 = vand.u32 65535, %v210_v6 }
  0xe3   : > { %v214_v8 = vcvt.s32.f32 %v212_v7  ;;  %v213_v11 = vcvt.s32.f32 %v211_v9 }
  0xe5   : > { %215 = vmin.xlane.f32.xlu0 %v214_v8 }
 0x16e   : > { %v216_v10 = vpop.xlane.xlu0 %215 }
 0x16f   : > { %vm217_vm2 = vcmp.eq.f32.partialorder %v214_v8, %v216_v10  ;;  %v222_v16 = vcvt.f32.s32 %v216_v10 }
 0x170   : > { %v218_v12 = vsel %vm217_vm2, %v213_v11, inf }
 0x171   : > { %219 = vmin.xlane.f32.xlu1 %v218_v12  ;;  %v223_v18 = vshll.u32 %v222_v16, 16 }
 0x1fa   : > { %v220_v17 = vpop.xlane.xlu1 %219 }
 0x1fb   : > { %v221_v19 = vcvt.f32.s32 %v220_v17 }
 0x1fd   : > { %v224_v20 = vadd.s32 %v223_v18, %v221_v19 }
 0x1ff   : > { %vm225_vm4 = vcmp.eq.s32.totalorder %v207_v3, %v224_v20 }
 0x200   : > { %v422_v21 = vsel %vm225_vm4, 1.0, %v624_v13 }
 0x201   : > { %437 = vmatmul.mubr.msk.f32.vlgmr.msra.gmra.mxu0 %vm202_vm0, %v422_v21 }
 0x2c1   : > { %v297_v22 = vpop.f32.mrf.mxu0 }
 0x2c2   : > { %302 = vst.msk [vmem:[%s198_s17] sm:$0xff] %vm301_vm5, %v297_v22 }
 0x2c3   : > { %v438_v23 = vpop.f32.mrf.mxu0 }
 0x2c4   : > { %563 = shalt.err (!%p560_p4)
}
 0x2c5   : > { %s564_s29 = scalar_lea.hbm %s803_s4, 128  ;;  %s568_s14 = scalar_lea.hbm %s848_s2, 256 }
 0x2c6   : > { %p565_p3 = scmp.ne.s32.totalorder %s803_s4, %s564_s29  ;;  %p569_p12 = scmp.lt.s32.totalorder %s803_s4, %s848_s2 }
 0x2c7   : > { %p570_p7 = scmp.lt.s32.totalorder %s568_s14, %s564_s29 }
 0x2c8   : > { %p566_p5 = pnand %p565_p3, %p859_p13 }
 0x2c9   : > { %p571_p1 = por %p570_p7, %p569_p12 }
 0x2ca   : > { %p567_p11 = pneg %p566_p5 }
 0x2cc   : > { %p572_p6 = pnand %p571_p1, %p567_p11 }
 0x2ce   : > { %575 = shalt.err (!%p572_p6)
}
 0x2cf   : > { %443 = dma.vmem_to_hbm [thread:$0]  (%p859_p13), %s805_s19, 128, %s803_s4, %s304_s25  }
 0x2d0 PF: > { %s329_s3 = sand.u32 1, %s606_s9   ;;  %p860_p9 = scmp.ne.s32.totalorder %s854_s22, 0 }
 0x2d1   : > { %p861_p8 = scmp.ge.s32.totalorder %s618_s12, 2  ;;  %s330_s5 = scalar_lea.sflag [#allocation4], %s329_s3 }
 0x2d3   : > { %p453_p10 = pnand %p861_p8, %p860_p9 }
 0x2d5   : > { %p454_p0 = pneg %p453_p10 }
 0x2d7   : > { %601 = dma.done.wait (%p454_p0), %s330_s5, 128  }
 0x2d8   : > { %603 = vsyncadd (%p454_p0), %s330_s5, 4294967168  ;;  %p18_p2 = scmp.ge.s32.totalorder %s667_s15, 4   ;;  %s862_s9 = smov %s610_s10 }
 0x2d9   : > { %s863_s10 = smov %s614_s11  ;;  %s864_s11 = smov %s679_s18 }
 0x2da   : > { %s865_s12 = smov %s667_s15  ;;  %20 = sbr.rel (!%p18_p2) target bundleno = 7 (0x7), region = 86 }
 0x2df   :  { %335 = vsyncpa [#allocation3], 1 }
 0x2e0   :  { %337 = vsyncpa [#allocation3 + $0x1], 1 }
 0x2e1   :  { %338 = vsyncpa [#allocation6], 1 }
 0x2e2   :  { %340 = vsyncpa [#allocation6 + $0x1], 1 }
 0x2e3   :  { %341 = vsyncpa [#allocation4], 1 }
 0x2e4   :  { %343 = vsyncpa [#allocation4 + $0x1], 1 }

</bundles_post_ra>
